<compile_context>
chip_gen: v6e
topology: v6e:2x2x1
jax: 0.10.0
libtpu: 0.0.40
codegen_flags: <defaults>
</compile_context>

<pallas_src>
import functools

import jax
import jax.numpy as jnp
from jax.experimental import pallas as pl
from jax.experimental.pallas import tpu as pltpu


def _round_up(n, m):
    return ((n + m - 1) // m) * m


def gaussian_encoder_kernel(x_ref, w1_ref, b1_ref, w2_ref, b2_ref,
                            w3m_ref, b3m_ref, w3s_ref, b3s_ref,
                            mean_ref, std_ref):
    # x_ref: (Bt, D) in compute dtype (bf16 or f32); biases are f32.
    x = x_ref[...]
    h1 = jnp.dot(x, w1_ref[...], preferred_element_type=jnp.float32)      # (Bt, H)
    h1 = jnp.maximum(h1 + b1_ref[...], 0.0)                               # f32 VPU
    h2 = jnp.dot(h1.astype(w2_ref.dtype), w2_ref[...],
                 preferred_element_type=jnp.float32)                      # (Bt, H)
    h2 = jnp.maximum(h2 + b2_ref[...], 0.0)
    h2c = h2.astype(w3m_ref.dtype)
    # torch.chunk(out, 2, dim=-1): first half -> mean, second half -> log_std.
    # The split is done on the weights (wrapper side), so each head is a plain
    # dot with an unmasked store -- no intra-vreg lane shuffle.
    mean_ref[...] = (jnp.dot(h2c, w3m_ref[...],
                             preferred_element_type=jnp.float32) + b3m_ref[...])
    std_ref[...] = jnp.exp(jnp.dot(h2c, w3s_ref[...],
                                   preferred_element_type=jnp.float32) + b3s_ref[...])


def gaussian_encoder_forward(x, params, *, block_b=None, use_bf16=True):
    """x: (B, F1, F2) float32.  Returns (mean, std), each (B, M) float32."""
    w1, b1, w2, b2, w3, b3 = params
    B = x.shape[0]
    D = x.shape[1] * x.shape[2]
    H = w1.shape[1]
    M = w3.shape[1] // 2

    cdt = jnp.bfloat16 if use_bf16 else jnp.float32
    sublane = 16 if use_bf16 else 8

    # Batch tile: multiple of the (bf16) sublane count; cap at 128.
    if block_b is None:
        block_b = min(128, _round_up(B, sublane))
    block_b = _round_up(block_b, sublane)
    Bp = _round_up(B, block_b)

    x2 = x.reshape(B, D)                     # Flatten() -- glue in plain JAX
    if Bp != B:
        x2 = jnp.pad(x2, ((0, Bp - B), (0, 0)))
    x2 = x2.astype(cdt)

    # Pre-split final layer into mean / log_std halves (column-wise -> same math).
    w3m, w3s = w3[:, :M], w3[:, M:]
    b3m, b3s = b3[:, :M], b3[:, M:]

    w1c, w2c, w3mc, w3sc = (w.astype(cdt) for w in (w1, w2, w3m, w3s))
    b1f, b2f, b3mf, b3sf = (b.astype(jnp.float32) for b in (b1, b2, b3m, b3s))

    num_blocks = Bp // block_b

    def resident(shape):
        # Grid-invariant index_map: DMA'd once, kept VMEM-resident across steps.
        return pl.BlockSpec(shape, lambda i: tuple(0 for _ in shape))

    itemsize = jnp.dtype(cdt).itemsize
    flops = 2 * Bp * (D * H + H * H + H * 2 * M)
    bytes_accessed = (
        Bp * D * itemsize                                   # x
        + (D * H + H * H + 2 * H * M) * itemsize            # weights
        + (2 * H + 2 * M) * 4                               # biases (f32)
        + 2 * Bp * M * 4                                    # mean, std (f32)
    )
    cost = pl.CostEstimate(flops=flops, transcendentals=Bp * M,
                           bytes_accessed=bytes_accessed)

    mean, std = pl.pallas_call(
        gaussian_encoder_kernel,
        out_shape=(jax.ShapeDtypeStruct((Bp, M), jnp.float32),
                   jax.ShapeDtypeStruct((Bp, M), jnp.float32)),
        grid=(num_blocks,),
        in_specs=[
            pl.BlockSpec((block_b, D), lambda i: (i, 0)),   # x: batch-tiled
            resident((D, H)), resident((1, H)),             # w1, b1
            resident((H, H)), resident((1, H)),             # w2, b2
            resident((H, M)), resident((1, M)),             # w3_mean, b3_mean
            resident((H, M)), resident((1, M)),             # w3_logstd, b3_logstd
        ],
        out_specs=(pl.BlockSpec((block_b, M), lambda i: (i, 0)),
                   pl.BlockSpec((block_b, M), lambda i: (i, 0))),
        compiler_params=pltpu.CompilerParams(
            dimension_semantics=("parallel",)),
        cost_estimate=cost,
    )(x2, w1c, b1f, w2c, b2f, w3mc, b3mf, w3sc, b3sf)

    if Bp != B:
        mean, std = mean[:B], std[:B]
    return mean, std


def init_params(key, D, H, M):
    """Deterministic synthetic weights (shapes from the implied encoder MLP)."""
    k1, k2, k3 = jax.random.split(key, 3)
    w1 = jax.random.normal(k1, (D, H), jnp.float32) * (1.0 / jnp.sqrt(D))
    b1 = jnp.zeros((1, H), jnp.float32)
    w2 = jax.random.normal(k2, (H, H), jnp.float32) * (1.0 / jnp.sqrt(H))
    b2 = jnp.zeros((1, H), jnp.float32)
    w3 = jax.random.normal(k3, (H, 2 * M), jnp.float32) * (1.0 / jnp.sqrt(H))
    b3 = jnp.zeros((1, 2 * M), jnp.float32)
    return (w1, b1, w2, b2, w3, b3)


def reference_forward(x, params, use_bf16=True):
    """Pure-JAX reference of the same forward (mirrors the bf16 operand cast)."""
    w1, b1, w2, b2, w3, b3 = params
    cdt = jnp.bfloat16 if use_bf16 else jnp.float32
    B = x.shape[0]
    x2 = x.reshape(B, -1).astype(cdt)
    h1 = jnp.maximum(
        jnp.dot(x2, w1.astype(cdt), preferred_element_type=jnp.float32) + b1, 0.0)
    h2 = jnp.maximum(
        jnp.dot(h1.astype(cdt), w2.astype(cdt),
                preferred_element_type=jnp.float32) + b2, 0.0)
    out = jnp.dot(h2.astype(cdt), w3.astype(cdt),
                  preferred_element_type=jnp.float32) + b3
    mean, log_std = jnp.split(out, 2, axis=-1)
    return mean, jnp.exp(log_std)


if __name__ == "__main__":
    B, F1, F2 = 64, 16, 16         # x: (batch, feature_dim1, feature_dim2)
    H, M = 128, 16                 # hidden width, latent dim

    key = jax.random.PRNGKey(0)
    kx, kp = jax.random.split(key)
    x = jax.random.normal(kx, (B, F1, F2), jnp.float32)
    params = init_params(kp, F1 * F2, H, M)

    fwd = functools.partial(gaussian_encoder_forward, block_b=16, use_bf16=True)
    mean, std = fwd(x, params)
    jax.block_until_ready((mean, std))

    mean_ref, std_ref = reference_forward(x, params, use_bf16=True)
    assert mean.shape == (B, M) and std.shape == (B, M)
    assert jnp.allclose(mean, mean_ref, atol=2e-3, rtol=2e-3)
    assert jnp.allclose(std, std_ref, atol=2e-3, rtol=2e-3)
    assert bool(jnp.all(std > 0))

    # TODO(synk): td.Independent(td.Normal(...), 1) (log_prob / rsample machinery)
    # is a distribution object, not a tensor op; we return its parameters (mean, std).
    print("KERNEL_OK")
</pallas_src>

<mosaic_0001>
module attributes {stable_mosaic.version = 11 : i64} {
  func.func @gaussian_encoder_kernel(%arg0: i32, %arg1: memref<16x256xbf16, #tpu.memory_space<vmem>>, %arg2: memref<256x128xbf16, #tpu.memory_space<vmem>>, %arg3: memref<1x128xf32, #tpu.memory_space<vmem>>, %arg4: memref<128x128xbf16, #tpu.memory_space<vmem>>, %arg5: memref<1x128xf32, #tpu.memory_space<vmem>>, %arg6: memref<128x16xbf16, #tpu.memory_space<vmem>>, %arg7: memref<1x16xf32, #tpu.memory_space<vmem>>, %arg8: memref<128x16xbf16, #tpu.memory_space<vmem>>, %arg9: memref<1x16xf32, #tpu.memory_space<vmem>>, %arg10: memref<16x16xf32, #tpu.memory_space<vmem>>, %arg11: memref<16x16xf32, #tpu.memory_space<vmem>>) attributes {dimension_semantics = [#tpu.dimension_semantics<parallel>], iteration_bounds = array<i64: 4>, scalar_prefetch = 0 : i64, scratch_operands = 0 : i64, tpu.core_type = #tpu.core_type<tc>, window_params = [{transform_indices = @transform_0, window_bounds = array<i64: 16, 256>}, {pipeline_mode = #tpu.pipeline_mode<synchronous>, transform_indices = @transform_1, window_bounds = array<i64: 256, 128>}, {pipeline_mode = #tpu.pipeline_mode<synchronous>, transform_indices = @transform_2, window_bounds = array<i64: 1, 128>}, {pipeline_mode = #tpu.pipeline_mode<synchronous>, transform_indices = @transform_3, window_bounds = array<i64: 128, 128>}, {pipeline_mode = #tpu.pipeline_mode<synchronous>, transform_indices = @transform_4, window_bounds = array<i64: 1, 128>}, {pipeline_mode = #tpu.pipeline_mode<synchronous>, transform_indices = @transform_5, window_bounds = array<i64: 128, 16>}, {pipeline_mode = #tpu.pipeline_mode<synchronous>, transform_indices = @transform_6, window_bounds = array<i64: 1, 16>}, {pipeline_mode = #tpu.pipeline_mode<synchronous>, transform_indices = @transform_7, window_bounds = array<i64: 128, 16>}, {pipeline_mode = #tpu.pipeline_mode<synchronous>, transform_indices = @transform_8, window_bounds = array<i64: 1, 16>}, {transform_indices = @transform_9, window_bounds = array<i64: 16, 16>}, {transform_indices = @transform_10, window_bounds = array<i64: 16, 16>}]} {
    %c0 = arith.constant 0 : index
    %c0_0 = arith.constant 0 : index
    %0 = vector.load %arg1[%c0, %c0_0] : memref<16x256xbf16, #tpu.memory_space<vmem>>, vector<16x256xbf16>
    %c0_1 = arith.constant 0 : index
    %c0_2 = arith.constant 0 : index
    %1 = vector.load %arg2[%c0_1, %c0_2] : memref<256x128xbf16, #tpu.memory_space<vmem>>, vector<256x128xbf16>
    %cst = arith.constant dense<0.000000e+00> : vector<16x128xf32>
    %2 = tpu.matmul %0, %1, %cst {dimension_numbers = #tpu.dot_dimension_numbers<[1], [0], [0], [1], [0, 0, 1, 1], [], []>} : vector<16x256xbf16>, vector<256x128xbf16>, vector<16x128xf32> -> vector<16x128xf32>
    %c0_3 = arith.constant 0 : index
    %c0_4 = arith.constant 0 : index
    %3 = vector.load %arg3[%c0_3, %c0_4] : memref<1x128xf32, #tpu.memory_space<vmem>>, vector<1x128xf32>
    %4 = vector.broadcast %3 : vector<1x128xf32> to vector<16x128xf32>
    %5 = arith.addf %2, %4 : vector<16x128xf32>
    %cst_5 = arith.constant 0.000000e+00 : f32
    %6 = vector.broadcast %cst_5 : f32 to vector<16x128xf32>
    %7 = arith.maximumf %5, %6 : vector<16x128xf32>
    %8 = arith.truncf %7 : vector<16x128xf32> to vector<16x128xbf16>
    %c0_6 = arith.constant 0 : index
    %c0_7 = arith.constant 0 : index
    %9 = vector.load %arg4[%c0_6, %c0_7] : memref<128x128xbf16, #tpu.memory_space<vmem>>, vector<128x128xbf16>
    %cst_8 = arith.constant dense<0.000000e+00> : vector<16x128xf32>
    %10 = tpu.matmul %8, %9, %cst_8 {dimension_numbers = #tpu.dot_dimension_numbers<[1], [0], [0], [1], [0, 0, 1, 1], [], []>} : vector<16x128xbf16>, vector<128x128xbf16>, vector<16x128xf32> -> vector<16x128xf32>
    %c0_9 = arith.constant 0 : index
    %c0_10 = arith.constant 0 : index
    %11 = vector.load %arg5[%c0_9, %c0_10] : memref<1x128xf32, #tpu.memory_space<vmem>>, vector<1x128xf32>
    %12 = vector.broadcast %11 : vector<1x128xf32> to vector<16x128xf32>
    %13 = arith.addf %10, %12 : vector<16x128xf32>
    %cst_11 = arith.constant 0.000000e+00 : f32
    %14 = vector.broadcast %cst_11 : f32 to vector<16x128xf32>
    %15 = arith.maximumf %13, %14 : vector<16x128xf32>
    %16 = arith.truncf %15 : vector<16x128xf32> to vector<16x128xbf16>
    %c0_12 = arith.constant 0 : index
    %c0_13 = arith.constant 0 : index
    %17 = vector.load %arg6[%c0_12, %c0_13] : memref<128x16xbf16, #tpu.memory_space<vmem>>, vector<128x16xbf16>
    %cst_14 = arith.constant dense<0.000000e+00> : vector<16x16xf32>
    %18 = tpu.matmul %16, %17, %cst_14 {dimension_numbers = #tpu.dot_dimension_numbers<[1], [0], [0], [1], [0, 0, 1, 1], [], []>} : vector<16x128xbf16>, vector<128x16xbf16>, vector<16x16xf32> -> vector<16x16xf32>
    %c0_15 = arith.constant 0 : index
    %c0_16 = arith.constant 0 : index
    %19 = vector.load %arg7[%c0_15, %c0_16] : memref<1x16xf32, #tpu.memory_space<vmem>>, vector<1x16xf32>
    %20 = vector.broadcast %19 : vector<1x16xf32> to vector<16x16xf32>
    %21 = arith.addf %18, %20 : vector<16x16xf32>
    %c0_17 = arith.constant 0 : index
    %c0_18 = arith.constant 0 : index
    %22 = vector.load %arg10[%c0_17, %c0_18] : memref<16x16xf32, #tpu.memory_space<vmem>>, vector<16x16xf32>
    tpu.vector_store %arg10[%c0_17, %c0_18], %21 {strides = array<i32>} : memref<16x16xf32, #tpu.memory_space<vmem>>, vector<16x16xf32>,
    %c0_19 = arith.constant 0 : index
    %c0_20 = arith.constant 0 : index
    %23 = vector.load %arg8[%c0_19, %c0_20] : memref<128x16xbf16, #tpu.memory_space<vmem>>, vector<128x16xbf16>
    %cst_21 = arith.constant dense<0.000000e+00> : vector<16x16xf32>
    %24 = tpu.matmul %16, %23, %cst_21 {dimension_numbers = #tpu.dot_dimension_numbers<[1], [0], [0], [1], [0, 0, 1, 1], [], []>} : vector<16x128xbf16>, vector<128x16xbf16>, vector<16x16xf32> -> vector<16x16xf32>
    %c0_22 = arith.constant 0 : index
    %c0_23 = arith.constant 0 : index
    %25 = vector.load %arg9[%c0_22, %c0_23] : memref<1x16xf32, #tpu.memory_space<vmem>>, vector<1x16xf32>
    %26 = vector.broadcast %25 : vector<1x16xf32> to vector<16x16xf32>
    %27 = arith.addf %24, %26 : vector<16x16xf32>
    %28 = math.exp %27 : vector<16x16xf32>
    %c0_24 = arith.constant 0 : index
    %c0_25 = arith.constant 0 : index
    %29 = vector.load %arg11[%c0_24, %c0_25] : memref<16x16xf32, #tpu.memory_space<vmem>>, vector<16x16xf32>
    tpu.vector_store %arg11[%c0_24, %c0_25], %28 {strides = array<i32>} : memref<16x16xf32, #tpu.memory_space<vmem>>, vector<16x16xf32>,
    return
  }
  func.func @transform_0(%arg0: i32) -> (i32, i32) {
    %c0_i32 = arith.constant 0 : i32
    %c0_i32_0 = arith.constant 0 : i32
    return %arg0, %c0_i32 : i32, i32
  }
  func.func @transform_1(%arg0: i32) -> (i32, i32) {
    %c0_i32 = arith.constant 0 : i32
    %c0_i32_0 = arith.constant 0 : i32
    %c0_i32_1 = arith.constant 0 : i32
    return %c0_i32, %c0_i32_0 : i32, i32
  }
  func.func @transform_2(%arg0: i32) -> (i32, i32) {
    %c0_i32 = arith.constant 0 : i32
    %c0_i32_0 = arith.constant 0 : i32
    %c0_i32_1 = arith.constant 0 : i32
    return %c0_i32, %c0_i32_0 : i32, i32
  }
  func.func @transform_3(%arg0: i32) -> (i32, i32) {
    %c0_i32 = arith.constant 0 : i32
    %c0_i32_0 = arith.constant 0 : i32
    %c0_i32_1 = arith.constant 0 : i32
    return %c0_i32, %c0_i32_0 : i32, i32
  }
  func.func @transform_4(%arg0: i32) -> (i32, i32) {
    %c0_i32 = arith.constant 0 : i32
    %c0_i32_0 = arith.constant 0 : i32
    %c0_i32_1 = arith.constant 0 : i32
    return %c0_i32, %c0_i32_0 : i32, i32
  }
  func.func @transform_5(%arg0: i32) -> (i32, i32) {
    %c0_i32 = arith.constant 0 : i32
    %c0_i32_0 = arith.constant 0 : i32
    %c0_i32_1 = arith.constant 0 : i32
    return %c0_i32, %c0_i32_0 : i32, i32
  }
  func.func @transform_6(%arg0: i32) -> (i32, i32) {
    %c0_i32 = arith.constant 0 : i32
    %c0_i32_0 = arith.constant 0 : i32
    %c0_i32_1 = arith.constant 0 : i32
    return %c0_i32, %c0_i32_0 : i32, i32
  }
  func.func @transform_7(%arg0: i32) -> (i32, i32) {
    %c0_i32 = arith.constant 0 : i32
    %c0_i32_0 = arith.constant 0 : i32
    %c0_i32_1 = arith.constant 0 : i32
    return %c0_i32, %c0_i32_0 : i32, i32
  }
  func.func @transform_8(%arg0: i32) -> (i32, i32) {
    %c0_i32 = arith.constant 0 : i32
    %c0_i32_0 = arith.constant 0 : i32
    %c0_i32_1 = arith.constant 0 : i32
    return %c0_i32, %c0_i32_0 : i32, i32
  }
  func.func @transform_9(%arg0: i32) -> (i32, i32) {
    %c0_i32 = arith.constant 0 : i32
    %c0_i32_0 = arith.constant 0 : i32
    return %arg0, %c0_i32 : i32, i32
  }
  func.func @transform_10(%arg0: i32) -> (i32, i32) {
    %c0_i32 = arith.constant 0 : i32
    %c0_i32_0 = arith.constant 0 : i32
    return %arg0, %c0_i32 : i32, i32
  }
}

</mosaic_0001>

<bundles_post_ra>
// kernel: tpu_custom_call.1
= control target key start
LH: loop header
LB: loop body
LE: loop exit
PB: predicated region body
PF: predicated region fallthrough
CT: control target
= control target key end

     0   :  { %s1779_s0 = inlined_call_operand.hbm [shape: bf16[64,256], index: 0, kind: input, shape index: {}]   ;;  %s1780_s1 = inlined_call_operand.vmem [shape: bf16[256,128], index: 1, kind: input, shape index: {}]   ;;  %s1781_s2 = inlined_call_operand.vmem [shape: f32[1,128], index: 2, kind: input, shape index: {}]   ;;  %s1782_s3 = inlined_call_operand.hbm [shape: bf16[128,128], index: 3, kind: input, shape index: {}]   ;;  %s1783_s4 = inlined_call_operand.vmem [shape: f32[1,128], index: 4, kind: input, shape index: {}]   ;;  %s1784_s5 = inlined_call_operand.vmem [shape: bf16[128,16], index: 5, kind: input, shape index: {}]   ;;  %s1785_s6 = inlined_call_operand.vmem [shape: f32[1,16], index: 6, kind: input, shape index: {}]   ;;  %s1786_s7 = inlined_call_operand.vmem [shape: bf16[128,16], index: 7, kind: input, shape index: {}]   ;;  %s1787_s8 = inlined_call_operand.vmem [shape: f32[1,16], index: 8, kind: input, shape index: {}]   ;;  %s1788_s9 = inlined_call_operand.vmem [shape: f32[64,16], index: 9, kind: output, shape index: {0}]   ;;  %s1789_s10 = inlined_call_operand.vmem [shape: f32[64,16], index: 10, kind: output, shape index: {1}]  }
   0x1   :  { %1797 = sst [smem:[#allocation9_spill]] %s1789_s10 }
   0x2   :  { %16 = vsyncpa [#allocation3], 0 }
   0x3   :  { %18 = vsyncpa [#allocation3 + $0x1], 0 }
   0x4   :  { %19 = vsyncpa [#allocation5], 0  ;;  %s1498_s13 = smov 0   ;;  %s1500_s14 = smov 0  }
   0x5   :  { %s1502_s15 = smov 0   ;;  %s1504_s16 = smov 0  }
   0x6 LB: > { %s1790_s17 = sadd.s32 4294967295, %s1433_s16   ;;  %p45_p0 = scmp.ne.s32.totalorder %s1425_s14, %s1421_s13  ;;  %s1433_s16 = sphi %s1504_s16, %s1809_s16   ;;  %s1429_s15 = sphi %s1502_s15, %s1812_s15   ;;  %s1425_s14 = sphi %s1500_s14, %s1811_s14   ;;  %s1421_s13 = sphi %s1498_s13, %s1810_s13  }
   0x7   : > { %p1520_p1 = scmp.eq.s32.totalorder %s1790_s17, 0  ;;  %p1065_p2 = scmp.ge.s32.totalorder %s1433_s16, 1 }
   0x8   : > { %p276_p3 = scmp.lt.s32.totalorder %s1433_s16, 5  ;;  %s1435_s21 = smov [#allocation4]  }
   0x9   : > { %s1798_s18 = scalar_select %p1520_p1, 1, 0 }
   0xa   : > { %p1528_p4 = por %p1520_p1, %p45_p0  ;;  %p1532_p5 = pnand %p1065_p2, %p276_p3 }
   0xb   : > { %s294_s22 = sshll.u32 %s1435_s21, 4  ;;  %s1545_s24 = sadd.s32 1, %s1433_s16   ;;  %s295_s22 = int_to_ptr.vmem [resolvable:$true] %s294_s22 }
   0xc   : > { %s1799_s19 = scalar_select %p1528_p4, 1, 0 }
   0xd   : > { %s1800_s20 = scalar_select %p1532_p5, 1, 0 }
   0xe   : > { %p1244_p6 = pneg %p1532_p5  ;;  %1802 = sst [smem:[#allocation8_spill]] %s1545_s24 }
   0xf   : > { %s32_s25 = sadd.s32 1, %s1429_s15  ;;  %s29_s26 = ssub.s32 %s1433_s16, %s1545_s24 }
  0x10   : > { %p1540_p7 = pnand %p1244_p6, %p1520_p1  ;;  %s1352_s27 = scalar_lea.vmem %s295_s22, 1024 }
  0x11   : > { %p1353_p9 = scmp.ne.s32.totalorder %s295_s22, %s1352_s27  ;;  %p1360_p12 = scmp.lt.s32.totalorder %s295_s22, %s295_s22 }
  0x12   : > { %p1343_p8 = pneg %p1540_p7  ;;  %p1361_p13 = scmp.lt.s32.totalorder %s1352_s27, %s1352_s27 }
  0x14   : > { %p1355_p10 = pnand %p1353_p9, %p1343_p8  ;;  %p1362_p0 = por %p1361_p13, %p1360_p12 }
  0x16   : > { %p1356_p11 = pneg %p1355_p10 }
  0x18   : > { %p1363_p2 = pnand %p1362_p0, %p1356_p11 }
  0x1a   : > { %1366 = shalt.err (!%p1363_p2)
}
  0x1b   : > { %s1436_s28 = smov 64   ;;  %s1437_s29 = smov 4  }
  0x1c   : > { %1247 = dma.hbm_to_vmem [thread:$0]  (!%p1540_p7), %s1782_s3, 1024, %s295_s22, [#allocation5], %s1436_s28, %s1436_s28, %s1437_s29  }
  0x1d   : > { %p30_p3 = scmp.eq.s32.totalorder %s29_s26, 0  ;;  %p39_p6 = scmp.ne.s32.totalorder %s1429_s15, %s1425_s14 }
  0x1e   : > { %p40_p8 = scmp.eq.s32.totalorder %s1433_s16, 0  ;;  %p1253_p9 = scmp.lt.s32.totalorder %s1433_s16, 4 }
  0x1f   : > { %s1562_s12 = scalar_select %p30_p3, %s1429_s15, %s32_s25  }
  0x20   : > { %p41_p10 = por %p40_p8, %p39_p6  ;;  %s323_s13 = sand.u32 1, %s1429_s15  }
  0x21   : > { %s1068_s21 = sshll.u32 %s323_s13, 4  ;;  %s1128_s27 = sshll.u32 %s1433_s16, 8 }
  0x22   : > { %s1569_s10 = scalar_lea.hbm %s1779_s0, %s1128_s27  ;;  %s327_s23 = scalar_lea.vmem [#allocation2], %s1068_s21 }
  0x23   : > { %s335_s22 = sshll.u32 %s327_s23, 4  ;;  %p1573_p7 = pnand %p1253_p9, %p41_p10  ;;  %s1571_s22 = int_to_ptr.vmem [resolvable:$true] %s335_s22 }
  0x24   : > { %s1577_s25 = scalar_lea.sflag [#allocation3], %s323_s13  ;;  %s1367_s28 = scalar_lea.hbm %s1569_s10, 256 }
  0x25   : > { %p1368_p11 = scmp.ne.s32.totalorder %s1569_s10, %s1367_s28  ;;  %p1369_p12 = pneg %p1573_p7 }
  0x26   : > { %s1372_s29 = scalar_lea.hbm %s1779_s0, 1024  ;;  %p1373_p2 = scmp.lt.s32.totalorder %s1569_s10, %s1779_s0 }
  0x27   : > { %p1370_p13 = pnand %p1369_p12, %p1368_p11  ;;  %p1374_p3 = scmp.lt.s32.totalorder %s1372_s29, %s1367_s28 }
  0x29   : > { %p1371_p0 = pneg %p1370_p13  ;;  %p1375_p6 = por %p1374_p3, %p1373_p2 }
  0x2b   : > { %p1376_p8 = pnand %p1375_p6, %p1371_p0 }
  0x2d   : > { %1379 = shalt.err (!%p1376_p8)
}
  0x2e   : > { %s1380_s13 = scalar_lea.vmem %s1571_s22, 256  ;;  %s1438_s21 = smov [#allocation2]  }
  0x2f   : > { %p1381_p9 = scmp.ne.s32.totalorder %s1571_s22, %s1380_s13  ;;  %s1385_s27 = sshll.u32 %s1438_s21, 4  ;;  %s1386_s27 = int_to_ptr.vmem [resolvable:$false] %s1385_s27 }
  0x30   : > { %s1387_s23 = scalar_lea.vmem %s1386_s27, 512  ;;  %p1388_p13 = scmp.lt.s32.totalorder %s1571_s22, %s1386_s27 }
  0x31   : > { %p1383_p10 = pnand %p1381_p9, %p1369_p12  ;;  %p1389_p1 = scmp.lt.s32.totalorder %s1387_s23, %s1380_s13 }
  0x33   : > { %p1384_p11 = pneg %p1383_p10  ;;  %p1390_p4 = por %p1389_p1, %p1388_p13 }
  0x35   : > { %p1391_p5 = pnand %p1390_p4, %p1384_p11 }
  0x37   : > { %1394 = shalt.err (!%p1391_p5)
}
  0x38   : > { %s1439_s28 = smov 128   ;;  %s1440_s17 = smov 8  }
  0x39   : > { %1251 = dma.hbm_to_vmem [thread:$0]  (!%p1573_p7), %s1569_s10, 256, %s1571_s22, %s1577_s25, %s1439_s28, %s1439_s28, %s1440_s17  }
  0x3a   : > { %p1804_p12 = scmp.ne.s32.totalorder %s1800_s20, 0 }
  0x3b   : > { %s349_s24 = sand.u32 (!%p1804_p12), 1, %s1425_s14   ;;  %p1805_p1 = scmp.ne.s32.totalorder (!%p1804_p12), %s1799_s19, 0 }
  0x3c   : > { %347 = sbr.rel (%p1804_p12) target bundleno = 728 (0x2d8), region = 56  ;;  %s1601_s29 = sshll.u32 (!%p1804_p12), %s349_s24, 4 }
  0x3d   : > { %s350_s30 = scalar_lea.sflag (!%p1804_p12), [#allocation3], %s349_s24  ;;  %s353_s11 = scalar_lea.vmem (!%p1804_p12), [#allocation2], %s1601_s29 }
  0x41   : > { %1412 = dma.done.wait (%p1805_p1), %s350_s30, 256  }
  0x42   : > { %1414 = vsyncadd (%p1805_p1), %s350_s30, 4294967040  ;;  %p1806_p4 = scmp.ne.s32.totalorder %s1798_s18, 0 }
  0x44   : > { %1416 = dma.done.wait (%p1806_p4), [#allocation5], 1024  }
  0x45   : > { %1418 = vsyncadd (%p1806_p4), [#allocation5], 4294966272  ;;  %v1441_v0 = vmov 0.0   ;;  %v1294_v1 = vld [vmem:[%s1780_s1 + $0x78] sm:$0xff]   ;;  %v1296_v3 = vld [vmem:[%s1780_s1 + $0x70] sm:$0xff]   ;;  %vm1442_vm0 = vmmov 0  }
  0x46   : > { %1178 = vmatprep.subr.bf16.mxu1 %v1441_v0  ;;  %v1295_v2 = vld [vmem:[%s1780_s1 + $0x38] sm:$0xff]   ;;  %1129 = vmatprep.subr.bf16.mxu0 %v1294_v1  ;;  %v1297_v4 = vld [vmem:[%s1780_s1 + $0x30] sm:$0xff]   ;;  %v1298_v5 = vld [vmem:[%s1780_s1 + $0x68] sm:$0xff]   ;;  %s1807_s22 = sadd.s32 4294967295, %s1433_s16   ;;  %vm831_vm1 = vcmask 130048   ;;  %s1808_s24 = sld [smem:[#allocation9_spill]] }
  0x47   : > { %1130 = vmatpush3.bf16.msra.mxu0 %v1295_v2  ;;  %v1299_v6 = vld [vmem:[%s1780_s1 + $0x28] sm:$0xff]   ;;  %v1300_v7 = vld [vmem:[%s1780_s1 + $0x60] sm:$0xff]   ;;  %v1302_v9 = vld [vmem:[%s1780_s1 + $0x58] sm:$0xff]   ;;  %1194 = vmatprep.mubr.msk.bf16.mxu1 %vm1442_vm0, %v1441_v0  ;;  %s1075_s26 = sshll.u32 %s1807_s22, 1 }
  0x48   : > { %1131 = vmatprep.subr.bf16.mxu0 %v1296_v3  ;;  %v1301_v8 = vld [vmem:[%s1780_s1 + $0x20] sm:$0xff]   ;;  %v1303_v10 = vld [vmem:[%s1780_s1 + $0x18] sm:$0xff]   ;;  %v1304_v11 = vld [vmem:[%s1780_s1 + $0x50] sm:$0xff]   ;;  %p401_p5 = scmp.lt.s32.totalorder %s1075_s26, 7 }
  0x49   : > { %v1305_v12 = vld [vmem:[%s1780_s1 + $0x10] sm:$0xff]   ;;  %v1313_v14 = vld [vmem:[#allocation4 + $0x38] sm:$0xff]   ;;  %v1306_v15 = vld [vmem:[%s1780_s1 + $0x48] sm:$0xff]  }
  0x4a   : > { %v1312_v13 = vld [vmem:[%s353_s11 + $0x4] ss:$8 sps:$4 sm:$0xff]   ;;  %1179 = vmatpush3.bf16.msra.mxu1 %v1313_v14  ;;  %v1310_v22 = vld [vmem:[%s353_s11] ss:$8 sps:$4 sm:$0xff]   ;;  %s1814_s26 = smov (!%p401_p5, %s1075_s26), 7 }
  0x4b   : > { %1132 = vmatpush3.bf16.msra.mxu0 %v1297_v4  ;;  %592 = vmatprep.mubr.bf16.mxu0 %v1312_v13  ;;  %v1314_v16 = vld [vmem:[#allocation4 + $0x30] sm:$0xff]   ;;  %v1307_v17 = vld [vmem:[%s1780_s1 + $0x8] sm:$0xff]   ;;  %v1308_v18 = vld [vmem:[%s1780_s1 + $0x40] sm:$0xff]   ;;  %s1076_s19 = sshll.u32 %s1814_s26, 3 }
  0x4c   : > { %1133 = vmatprep.subr.bf16.mxu0 %v1298_v5  ;;  %1180 = vmatprep.subr.bf16.mxu1 %v1441_v0  ;;  %v1315_v19 = vld [vmem:[#allocation4 + $0x28] sm:$0xff]   ;;  %v1309_v20 = vld [vmem:[%s1780_s1] sm:$0xff]   ;;  %v1317_v23 = vld [vmem:[#allocation4 + $0x18] sm:$0xff]   ;;  %s404_s28 = scalar_lea.vmem %s1788_s9, %s1076_s19  ;;  %s410_s30 = scalar_lea.vmem %s1808_s24, %s1076_s19 }
  0x4d   : > { %v1316_v21 = vld [vmem:[#allocation4 + $0x20] sm:$0xff]   ;;  %v1318_v24 = vld [vmem:[#allocation4 + $0x10] sm:$0xff]   ;;  %v1319_v25 = vld [vmem:[#allocation4 + $0x8] sm:$0xff]  }
  0x4e   : > { %1181 = vmatpush3.bf16.msra.mxu1 %v1314_v16  ;;  %v1320_v26 = vld [vmem:[#allocation4] sm:$0xff]   ;;  %v1321_v27 = vld [vmem:[%s1784_s5 + $0x38] sm:$0xff]   ;;  %v1323_v28 = vld [vmem:[%s1784_s5 + $0x30] sm:$0xff]  }
  0x4f   : > { %1134 = vmatpush3.bf16.msra.mxu0 %v1299_v6  ;;  %1182 = vmatprep.subr.bf16.mxu1 %v1441_v0  ;;  %v1325_v29 = vld [vmem:[%s1784_s5 + $0x28] sm:$0xff]   ;;  %v1327_v30 = vld [vmem:[%s1784_s5 + $0x20] sm:$0xff]   ;;  %v1329_v31 = vld [vmem:[%s1784_s5 + $0x18] sm:$0xff]  }
  0x50   : > { %1135 = vmatprep.subr.bf16.mxu0 %v1300_v7  ;;  %v1079_v35 = vld [vmem:[%s1781_s2] ss:$0 sm:$0xff]  ;;  %v1322_v43 = vld [vmem:[%s1786_s7 + $0x38] sm:$0xff]   ;;  %v1324_v45 = vld [vmem:[%s1786_s7 + $0x30] sm:$0xff]  }
  0x51   : > { %v1326_v46 = vld [vmem:[%s1786_s7 + $0x28] sm:$0xff]   ;;  %v1328_v47 = vld [vmem:[%s1786_s7 + $0x20] sm:$0xff]   ;;  %v1330_v48 = vld [vmem:[%s1786_s7 + $0x18] sm:$0xff]  }
  0x52   : > { %1183 = vmatpush3.bf16.msra.mxu1 %v1315_v19  ;;  %v1331_v49 = vld [vmem:[%s1784_s5 + $0x10] sm:$0xff]   ;;  %v1333_v51 = vld [vmem:[%s1784_s5 + $0x8] sm:$0xff]   ;;  %v1335_v53 = vld [vmem:[%s1784_s5] sm:$0xff]  }
  0x53   : > { %1136 = vmatpush3.bf16.msra.mxu0 %v1301_v8  ;;  %1184 = vmatprep.subr.bf16.mxu1 %v1441_v0  ;;  %v1332_v50 = vld [vmem:[%s1786_s7 + $0x10] sm:$0xff]   ;;  %v1334_v52 = vld [vmem:[%s1786_s7 + $0x8] sm:$0xff]   ;;  %v1336_v54 = vld [vmem:[%s1786_s7] sm:$0xff]  }
  0x54   : > { %1137 = vmatprep.subr.bf16.mxu0 %v1302_v9  ;;  %v1098_v55 = vld [vmem:[%s1783_s4] ss:$0 sm:$0xff] }
  0x55   : > { %v1107_v1 = vld [vmem:[%s1785_s6] ss:$0 sm:$0xff] }
  0x56   : > { %1185 = vmatpush3.bf16.msra.mxu1 %v1316_v21  ;;  %v1116_v2 = vld [vmem:[%s1787_s8] ss:$0 sm:$0xff] }
  0x57   : > { %1138 = vmatpush3.bf16.msra.mxu0 %v1303_v10  ;;  %1186 = vmatprep.subr.bf16.mxu1 %v1441_v0 }
  0x58   : > { %1139 = vmatprep.subr.bf16.mxu0 %v1304_v11 }
  0x5a   : > { %1187 = vmatpush3.bf16.msra.mxu1 %v1317_v23 }
  0x5b   : > { %1140 = vmatpush3.bf16.msra.mxu0 %v1305_v12  ;;  %1188 = vmatprep.subr.bf16.mxu1 %v1441_v0 }
  0x5c   : > { %1141 = vmatprep.subr.bf16.mxu0 %v1306_v15 }
  0x5e   : > { %1189 = vmatpush3.bf16.msra.mxu1 %v1318_v24 }
  0x5f   : > { %1142 = vmatpush3.bf16.msra.mxu0 %v1307_v17  ;;  %1190 = vmatprep.subr.bf16.mxu1 %v1441_v0 }
  0x60   : > { %1143 = vmatprep.subr.bf16.mxu0 %v1308_v18 }
  0x62   : > { %1191 = vmatpush3.bf16.msra.mxu1 %v1319_v25 }
  0x63   : > { %1144 = vmatpush3.bf16.msra.mxu0 %v1309_v20  ;;  %1192 = vmatprep.subr.bf16.mxu1 %v1441_v0 }
  0x64   : > { %1198 = vmatprep.subr.bf16.mxu0 %v1441_v0 }
  0x66   : > { %593 = vmatmul.mubr.bf16.vlgmr.msra.gmra.mxu0 %v1310_v22  ;;  %1193 = vmatpush3.bf16.msra.mxu1 %v1320_v26 }
  0x67   : > { %1218 = vmatprep.subr.bf16.mxu1 %v1441_v0  ;;  %1214 = vmatprep.mubr.msk.bf16.mxu0 %vm1442_vm0, %v1441_v0 }
  0x68   : > { %1199 = vmatpush3.bf16.msra.mxu0 %v1321_v27 }
  0x69   : > { %1200 = vmatprep.subr.bf16.mxu0 %v1441_v0 }
  0x6c   : > { %1201 = vmatpush3.bf16.msra.mxu0 %v1323_v28 }
  0x6d   : > { %1202 = vmatprep.subr.bf16.mxu0 %v1441_v0 }
  0x70   : > { %1203 = vmatpush3.bf16.msra.mxu0 %v1325_v29 }
  0x71   : > { %1204 = vmatprep.subr.bf16.mxu0 %v1441_v0 }
  0x74   : > { %1205 = vmatpush3.bf16.msra.mxu0 %v1327_v30 }
  0x75   : > { %1206 = vmatprep.subr.bf16.mxu0 %v1441_v0 }
  0x78   : > { %1207 = vmatpush3.bf16.msra.mxu0 %v1329_v31 }
  0x79   : > { %1208 = vmatprep.subr.bf16.mxu0 %v1441_v0 }
  0x7c   : > { %1209 = vmatpush3.bf16.msra.mxu0 %v1331_v49 }
  0x7d   : > { %1210 = vmatprep.subr.bf16.mxu0 %v1441_v0 }
  0x80   : > { %1211 = vmatpush3.bf16.msra.mxu0 %v1333_v51 }
  0x81   : > { %1212 = vmatprep.subr.bf16.mxu0 %v1441_v0 }
  0x84   : > { %1213 = vmatpush3.bf16.msra.mxu0 %v1335_v53 }
 0x126   : > { %v1145_v32 = vpop.f32.mrf.mxu0 }
 0x128   : > { %v1146_v33 = vpop.f32.mrf.mxu0 }
 0x129   : > { %v1147_v34 = vadd.f32 %v1146_v33, %v1145_v32 }
 0x12a   : > { %v1148_v36 = vpop.f32.mrf.mxu0 }
 0x12b   : > { %v595_v38 = vadd.f32 %v1147_v34, %v1079_v35 }
 0x12c   : > { %v1149_v37 = vpop.f32.mrf.mxu0 }
 0x12d   : > { %v1150_v39 = vadd.f32 %v1149_v37, %v1148_v36  ;;  %v601_v41 = vmax.f32 %v595_v38, 0.0 }
 0x12f   : > { %v598_v40 = vadd.f32 %v1150_v39, %v1079_v35 }
 0x131   : > { %v602_v42 = vmax.f32 %v598_v40, 0.0 }
 0x133   : > { %v603_v44 = vpack.c.bf16 %v602_v42, %v601_v41 }
 0x135   : > { %1195 = vmatmul.mubr.bf16.vlgmr.msra.gmra.mxu1 %v603_v44 }
 0x136   : > { %1219 = vmatpush3.bf16.msra.mxu1 %v1322_v43  ;;  %1234 = vmatprep.mubr.msk.bf16.mxu1 %vm1442_vm0, %v1441_v0 }
 0x137   : > { %1220 = vmatprep.subr.bf16.mxu1 %v1441_v0 }
 0x13a   : > { %1221 = vmatpush3.bf16.msra.mxu1 %v1324_v45 }
 0x13b   : > { %1222 = vmatprep.subr.bf16.mxu1 %v1441_v0 }
 0x13e   : > { %1223 = vmatpush3.bf16.msra.mxu1 %v1326_v46 }
 0x13f   : > { %1224 = vmatprep.subr.bf16.mxu1 %v1441_v0 }
 0x142   : > { %1225 = vmatpush3.bf16.msra.mxu1 %v1328_v47 }
 0x143   : > { %1226 = vmatprep.subr.bf16.mxu1 %v1441_v0 }
 0x146   : > { %1227 = vmatpush3.bf16.msra.mxu1 %v1330_v48 }
 0x147   : > { %1228 = vmatprep.subr.bf16.mxu1 %v1441_v0 }
 0x14a   : > { %1229 = vmatpush3.bf16.msra.mxu1 %v1332_v50 }
 0x14b   : > { %1230 = vmatprep.subr.bf16.mxu1 %v1441_v0 }
 0x14e   : > { %1231 = vmatpush3.bf16.msra.mxu1 %v1334_v52 }
 0x14f   : > { %1232 = vmatprep.subr.bf16.mxu1 %v1441_v0 }
 0x152   : > { %1233 = vmatpush3.bf16.msra.mxu1 %v1336_v54 }
 0x1f5   : > { %v709_v56 = vpop.f32.mrf.mxu1 }
 0x1f6   : > { %v710_v58 = vadd.f32 %v1098_v55, %v709_v56 }
 0x1f7   : > { %v1196_v57 = vpop.f32.mrf.mxu1 }
 0x1f8   : > { %v716_v62 = vmax.f32 %v710_v58, 0.0 }
 0x1f9   : > { %v712_v59 = vpop.f32.mrf.mxu1 }
 0x1fa   : > { %v713_v60 = vadd.f32 %v1098_v55, %v712_v59 }
 0x1fb   : > { %v1197_v61 = vpop.f32.mrf.mxu1 }
 0x1fc   : > { %v717_v63 = vmax.f32 %v713_v60, 0.0 }
 0x1fe   : > { %v718_v0 = vpack.c.bf16 %v717_v63, %v716_v62 }
 0x200   : > { %1215 = vmatmul.mubr.bf16.vlgmr.msra.gmra.mxu0 %v718_v0  ;;  %1235 = vmatmul.mubr.bf16.vlgmr.msra.gmra.mxu1 %v718_v0 }
 0x2c0   : > { %v824_v3 = vpop.f32.mrf.mxu0  ;;  %v939_v4 = vpop.f32.mrf.mxu1 }
 0x2c1   : > { %v825_v5 = vadd.f32 %v1107_v1, %v824_v3  ;;  %v940_v6 = vadd.f32 %v1116_v2, %v939_v4 }
 0x2c2   : > { %v1216_v7 = vpop.f32.mrf.mxu0  ;;  %v1236_v8 = vpop.f32.mrf.mxu1 }
 0x2c3   : > { %832 = vst.msk [vmem:[%s404_s28] sm:$0xff] %vm831_vm1, %v825_v5  ;;  %v946_v9 = vmul.f32 1.442695, %v940_v6 }
 0x2c4   : > { %v827_v10 = vpop.f32.mrf.mxu0  ;;  %v942_v11 = vpop.f32.mrf.mxu1 }
 0x2c5   : > { %1337 = vpow2.f32 %v946_v9  ;;  %v828_v12 = vadd.f32 %v1107_v1, %v827_v10  ;;  %v943_v13 = vadd.f32 %v1116_v2, %v942_v11 }
 0x2c6   : > { %v1217_v14 = vpop.f32.mrf.mxu0  ;;  %v1237_v15 = vpop.f32.mrf.mxu1 }
 0x2c7   : > { %833 = vst.msk [vmem:[%s404_s28 + $0x8] sm:$0xff] %vm831_vm1, %v828_v12  ;;  %v948_v16 = vmul.f32 1.442695, %v943_v13 }
 0x2c9   : > { %1339 = vpow2.f32 %v948_v16 }
 0x2d2   : > { %v1338_v17 = vpop.eup %1337 }
 0x2d3   : > { %950 = vst.msk [vmem:[%s410_s30] sm:$0xff] %vm831_vm1, %v1338_v17 }
 0x2d6   : > { %v1340_v18 = vpop.eup %1339 }
 0x2d7   : > { %951 = vst.msk [vmem:[%s410_s30 + $0x8] sm:$0xff] %vm831_vm1, %v1340_v18 }
 0x2d8 PF: > { %s1809_s16 = sld [smem:[#allocation8_spill]]  ;;  %s1810_s13 = smov %s1425_s14 }
 0x2d9   : > { %s1811_s14 = smov %s1429_s15  ;;  %s1812_s15 = smov %s1562_s12 }
 0x2de   : > { %p22_p7 = scmp.ge.s32.totalorder %s1809_s16, 6  }
 0x2e0   :  { %24 = sbr.rel (!%p22_p7) target bundleno = 6 (0x6), region = 112 }
 0x2e5   :  { %991 = vsyncpa [#allocation3], 1 }
 0x2e6   :  { %993 = vsyncpa [#allocation3 + $0x1], 1 }
 0x2e7   :  { %994 = vsyncpa [#allocation5], 1 }

</bundles_post_ra>
